<compile_context>
chip_gen: v5e
topology: v5e:2x2
jax: 0.10.0
libtpu: 0.0.40
codegen_flags: <defaults>
</compile_context>

<pallas_src>
import functools
import math

import jax
import jax.numpy as jnp
import numpy as np
from jax.experimental import pallas as pl
from jax.experimental.pallas import tpu as pltpu


_SQRT_HALF = 0.7071067811865476
_LANE = 128


def _round_up(x, m):
    return ((x + m - 1) // m) * m


def _erf_approx(x):
    # Abramowitz & Stegun 7.1.26, |abs err| < 1.5e-7.  Uses only ops with
    # Pallas TPU lowerings (exp runs on the EUP slot, the rest on the VPU).
    a1, a2, a3, a4, a5 = (0.254829592, -0.284496736, 1.421413741,
                          -1.453152027, 1.061405429)
    p = 0.3275911
    ax = jnp.abs(x)
    t = 1.0 / (1.0 + p * ax)
    poly = ((((a5 * t + a4) * t + a3) * t + a2) * t + a1) * t
    y = 1.0 - poly * jnp.exp(-(ax * ax))
    return jnp.where(x < 0, -y, y)


def _gelu_exact(x):
    # Matches torch.nn.GELU() default (approximate='none'): 0.5*x*(1+erf(x/sqrt(2)))
    return 0.5 * x * (1.0 + _erf_approx(x * _SQRT_HALF))


# ---------------------------------------------------------------------------
# Pallas kernel: one lane-dense column tile of X^T per grid step.
# ---------------------------------------------------------------------------
def spatial_mlp_kernel(x_ref, w1_ref, w2_ref, o_ref):
    # x_ref : (N1, TM)  bf16  column tile of X^T (columns = (b,p1,p2,c) groups)
    # w1_ref: (Nh, N1)  bf16  fc1.weight, used as stored (LHS of W1 @ X^T)
    # w2_ref: (N1, Nh)  bf16  fc2.weight, used as stored
    # o_ref : (N1, TM)  f32   column tile of Y^T
    h = jnp.dot(w1_ref[...], x_ref[...],
                preferred_element_type=jnp.float32)          # (Nh, TM) f32
    h = _gelu_exact(h)
    y = jnp.dot(w2_ref[...], h.astype(w2_ref.dtype),
                preferred_element_type=jnp.float32)          # (N1, TM) f32
    y = _gelu_exact(y)
    o_ref[...] = y.astype(o_ref.dtype)


def spatial_mlp_pallas(x_t, w1, w2, *, tile_m):
    """x_t: [N1, BD_pad] bf16 (BD_pad % tile_m == 0); w1: [Nh, N1]; w2: [N1, Nh]."""
    N1, BDp = x_t.shape
    Nh = w1.shape[0]
    grid_m = BDp // tile_m

    cost = pl.CostEstimate(
        flops=4 * N1 * Nh * BDp,                    # two matmuls
        transcendentals=(Nh + N1) * BDp,            # one exp per GELU element
        bytes_accessed=(x_t.size * 2 + w1.size * 2 + w2.size * 2 + N1 * BDp * 4),
    )

    return pl.pallas_call(
        spatial_mlp_kernel,
        out_shape=jax.ShapeDtypeStruct((N1, BDp), jnp.float32),
        grid_spec=pltpu.PrefetchScalarGridSpec(
            num_scalar_prefetch=0,
            grid=(grid_m,),
            in_specs=[
                pl.BlockSpec((N1, tile_m), lambda m: (0, m)),   # activations
                pl.BlockSpec((Nh, N1), lambda m: (0, 0)),       # W1: grid-invariant
                pl.BlockSpec((N1, Nh), lambda m: (0, 0)),       # W2: grid-invariant
            ],
            out_specs=pl.BlockSpec((N1, tile_m), lambda m: (0, m)),
        ),
        compiler_params=pltpu.CompilerParams(
            dimension_semantics=("parallel",),      # shard column tiles over TCs (v7x)
            vmem_limit_bytes=32 * 1024 * 1024,
        ),
        cost_estimate=cost,
    )(x_t, w1, w2)


# ---------------------------------------------------------------------------
# Layout glue (pure reshape/transpose, done once outside the kernel).
# ---------------------------------------------------------------------------
def rearrange_fwd_t(x, p1, p2):
    # b (h p1) (w p2) c -> (h w) (b p1 p2 c)     i.e. X^T, lane-dense columns
    B, H, W, C = x.shape
    h, w = H // p1, W // p2
    x = x.reshape(B, h, p1, w, p2, C)
    x = jnp.transpose(x, (1, 3, 0, 2, 4, 5))      # h w b p1 p2 c
    return x.reshape(h * w, B * p1 * p2 * C)


def rearrange_bwd_t(y_t, B, p1, p2, h, w, C):
    # (h w) (b p1 p2 c) -> b (h p1) (w p2) c
    y = y_t.reshape(h, w, B, p1, p2, C)
    y = jnp.transpose(y, (2, 0, 3, 1, 4, 5))      # b h p1 w p2 c
    return y.reshape(B, h * p1, w * p2, C)


@functools.partial(jax.jit, static_argnames=("p1", "p2", "max_tile"))
def spatial_mlp_forward(x, w1, w2, p1=4, p2=4, max_tile=512):
    """x: [B, H, W, C]; w1: [Nh, N1] (fc1.weight); w2: [N1, Nh] (fc2.weight)."""
    B, H, W, C = x.shape
    h, w = H // p1, W // p2
    BD = B * p1 * p2 * C

    tm = min(max_tile, _round_up(BD, _LANE))
    BD_pad = _round_up(BD, tm)

    x_t = rearrange_fwd_t(x, p1, p2).astype(jnp.bfloat16)    # (N1, BD) bf16
    if BD_pad != BD:
        x_t = jnp.pad(x_t, ((0, 0), (0, BD_pad - BD)))

    # Weights consumed as stored (no .T); bf16 cast only (half the HBM bytes).
    y_t = spatial_mlp_pallas(x_t, w1.astype(jnp.bfloat16), w2.astype(jnp.bfloat16),
                             tile_m=tm)
    y_t = y_t[:, :BD].astype(x.dtype)
    return rearrange_bwd_t(y_t, B, p1, p2, h, w, C)


# ---------------------------------------------------------------------------
# Pure-JAX reference (exact erf GELU, original einops layout) for validation.
# ---------------------------------------------------------------------------
def reference_forward(x, w1, w2, p1=4, p2=4):
    B, H, W, C = x.shape
    h, w = H // p1, W // p2
    xr = x.reshape(B, h, p1, w, p2, C)
    xr = jnp.transpose(xr, (0, 2, 4, 5, 1, 3)).reshape(B, p1 * p2 * C, h * w)
    y = jax.nn.gelu(xr @ w1.T, approximate=False)
    y = jax.nn.gelu(y @ w2.T, approximate=False)
    y = y.reshape(B, p1, p2, C, h, w)
    return jnp.transpose(y, (0, 4, 1, 5, 2, 3)).reshape(B, h * p1, w * p2, C)


if __name__ == "__main__":
    # Small shapes consistent with the module: N = H*W tokens, patch (4,4).
    B, H, W, C = 2, 16, 16, 4
    p1, p2 = 4, 4
    mlp_ratio = 4
    N = H * W
    N1 = N // (p1 * p2)          # 16
    Nh = N1 * mlp_ratio          # 64

    key = jax.random.PRNGKey(0)
    kx, k1, k2 = jax.random.split(key, 3)
    x = jax.random.normal(kx, (B, H, W, C), dtype=jnp.float32)
    # nn.Linear default init: U(-1/sqrt(fan_in), 1/sqrt(fan_in)), bias=False
    w1 = jax.random.uniform(k1, (Nh, N1), jnp.float32,
                            -1.0 / math.sqrt(N1), 1.0 / math.sqrt(N1))
    w2 = jax.random.uniform(k2, (N1, Nh), jnp.float32,
                            -1.0 / math.sqrt(Nh), 1.0 / math.sqrt(Nh))

    out = jax.block_until_ready(spatial_mlp_forward(x, w1, w2, p1=p1, p2=p2))
    ref = reference_forward(x, w1, w2, p1=p1, p2=p2)

    # bf16 MXU inputs (f32 accumulation) -> loose-ish tolerance vs f32 reference.
    np.testing.assert_allclose(np.asarray(out), np.asarray(ref), rtol=2e-2, atol=2e-2)
    assert out.shape == (B, H, W, C)
    print("KERNEL_OK")
</pallas_src>

<mosaic_0001>
module attributes {stable_mosaic.version = 11 : i64} {
  func.func @spatial_mlp_kernel(%arg0: i32, %arg1: memref<16x128xbf16, #tpu.memory_space<vmem>>, %arg2: memref<64x16xbf16, #tpu.memory_space<vmem>>, %arg3: memref<16x64xbf16, #tpu.memory_space<vmem>>, %arg4: memref<16x128xf32, #tpu.memory_space<vmem>>) attributes {dimension_semantics = [#tpu.dimension_semantics<parallel>], iteration_bounds = array<i64: 1>, scalar_prefetch = 0 : i64, scratch_operands = 0 : i64, tpu.core_type = #tpu.core_type<tc>, window_params = [{transform_indices = @transform_0, window_bounds = array<i64: 16, 128>}, {pipeline_mode = #tpu.pipeline_mode<synchronous>, transform_indices = @transform_1, window_bounds = array<i64: 64, 16>}, {pipeline_mode = #tpu.pipeline_mode<synchronous>, transform_indices = @transform_2, window_bounds = array<i64: 16, 64>}, {transform_indices = @transform_3, window_bounds = array<i64: 16, 128>}]} {
    %c0 = arith.constant 0 : index
    %c0_0 = arith.constant 0 : index
    %0 = vector.load %arg2[%c0, %c0_0] : memref<64x16xbf16, #tpu.memory_space<vmem>>, vector<64x16xbf16>
    %c0_1 = arith.constant 0 : index
    %c0_2 = arith.constant 0 : index
    %1 = vector.load %arg1[%c0_1, %c0_2] : memref<16x128xbf16, #tpu.memory_space<vmem>>, vector<16x128xbf16>
    %cst = arith.constant dense<0.000000e+00> : vector<64x128xf32>
    %2 = tpu.matmul %0, %1, %cst {dimension_numbers = #tpu.dot_dimension_numbers<[1], [0], [0], [1], [0, 0, 1, 1], [], []>} : vector<64x16xbf16>, vector<16x128xbf16>, vector<64x128xf32> -> vector<64x128xf32>
    %cst_3 = arith.constant 5.000000e-01 : f32
    %3 = vector.broadcast %cst_3 : f32 to vector<64x128xf32>
    %4 = arith.mulf %3, %2 : vector<64x128xf32>
    %cst_4 = arith.constant 0.707106769 : f32
    %5 = vector.broadcast %cst_4 : f32 to vector<64x128xf32>
    %6 = arith.mulf %2, %5 : vector<64x128xf32>
    %7 = math.absf %6 : vector<64x128xf32>
    %cst_5 = arith.constant 0.327591091 : f32
    %8 = vector.broadcast %cst_5 : f32 to vector<64x128xf32>
    %9 = arith.mulf %8, %7 : vector<64x128xf32>
    %cst_6 = arith.constant 1.000000e+00 : f32
    %10 = vector.broadcast %cst_6 : f32 to vector<64x128xf32>
    %11 = arith.addf %10, %9 : vector<64x128xf32>
    %cst_7 = arith.constant 1.000000e+00 : f32
    %12 = vector.broadcast %cst_7 : f32 to vector<64x128xf32>
    %13 = arith.divf %12, %11 : vector<64x128xf32>
    %cst_8 = arith.constant 1.06140542 : f32
    %14 = vector.broadcast %cst_8 : f32 to vector<64x128xf32>
    %15 = arith.mulf %14, %13 : vector<64x128xf32>
    %cst_9 = arith.constant -1.45315206 : f32
    %16 = vector.broadcast %cst_9 : f32 to vector<64x128xf32>
    %17 = arith.addf %15, %16 : vector<64x128xf32>
    %18 = arith.mulf %17, %13 : vector<64x128xf32>
    %cst_10 = arith.constant 1.42141378 : f32
    %19 = vector.broadcast %cst_10 : f32 to vector<64x128xf32>
    %20 = arith.addf %18, %19 : vector<64x128xf32>
    %21 = arith.mulf %20, %13 : vector<64x128xf32>
    %cst_11 = arith.constant -0.284496725 : f32
    %22 = vector.broadcast %cst_11 : f32 to vector<64x128xf32>
    %23 = arith.addf %21, %22 : vector<64x128xf32>
    %24 = arith.mulf %23, %13 : vector<64x128xf32>
    %cst_12 = arith.constant 0.254829586 : f32
    %25 = vector.broadcast %cst_12 : f32 to vector<64x128xf32>
    %26 = arith.addf %24, %25 : vector<64x128xf32>
    %27 = arith.mulf %26, %13 : vector<64x128xf32>
    %28 = arith.mulf %7, %7 : vector<64x128xf32>
    %cst_13 = arith.constant 0.000000e+00 : f32
    %29 = vector.broadcast %cst_13 : f32 to vector<64x128xf32>
    %30 = arith.subf %29, %28 : vector<64x128xf32>
    %31 = math.exp %30 : vector<64x128xf32>
    %32 = arith.mulf %27, %31 : vector<64x128xf32>
    %cst_14 = arith.constant 1.000000e+00 : f32
    %33 = vector.broadcast %cst_14 : f32 to vector<64x128xf32>
    %34 = arith.subf %33, %32 : vector<64x128xf32>
    %cst_15 = arith.constant 0.000000e+00 : f32
    %35 = vector.broadcast %cst_15 : f32 to vector<64x128xf32>
    %36 = arith.cmpf olt, %6, %35 : vector<64x128xf32>
    %cst_16 = arith.constant 0.000000e+00 : f32
    %37 = vector.broadcast %cst_16 : f32 to vector<64x128xf32>
    %38 = arith.subf %37, %34 : vector<64x128xf32>
    %39 = arith.select %36, %38, %34 : vector<64x128xi1>, vector<64x128xf32>
    %cst_17 = arith.constant 1.000000e+00 : f32
    %40 = vector.broadcast %cst_17 : f32 to vector<64x128xf32>
    %41 = arith.addf %40, %39 : vector<64x128xf32>
    %42 = arith.mulf %4, %41 : vector<64x128xf32>
    %c0_18 = arith.constant 0 : index
    %c0_19 = arith.constant 0 : index
    %43 = vector.load %arg3[%c0_18, %c0_19] : memref<16x64xbf16, #tpu.memory_space<vmem>>, vector<16x64xbf16>
    %44 = arith.truncf %42 : vector<64x128xf32> to vector<64x128xbf16>
    %cst_20 = arith.constant dense<0.000000e+00> : vector<16x128xf32>
    %45 = tpu.matmul %43, %44, %cst_20 {dimension_numbers = #tpu.dot_dimension_numbers<[1], [0], [0], [1], [0, 0, 1, 1], [], []>} : vector<16x64xbf16>, vector<64x128xbf16>, vector<16x128xf32> -> vector<16x128xf32>
    %cst_21 = arith.constant 5.000000e-01 : f32
    %46 = vector.broadcast %cst_21 : f32 to vector<16x128xf32>
    %47 = arith.mulf %46, %45 : vector<16x128xf32>
    %cst_22 = arith.constant 0.707106769 : f32
    %48 = vector.broadcast %cst_22 : f32 to vector<16x128xf32>
    %49 = arith.mulf %45, %48 : vector<16x128xf32>
    %50 = math.absf %49 : vector<16x128xf32>
    %cst_23 = arith.constant 0.327591091 : f32
    %51 = vector.broadcast %cst_23 : f32 to vector<16x128xf32>
    %52 = arith.mulf %51, %50 : vector<16x128xf32>
    %cst_24 = arith.constant 1.000000e+00 : f32
    %53 = vector.broadcast %cst_24 : f32 to vector<16x128xf32>
    %54 = arith.addf %53, %52 : vector<16x128xf32>
    %cst_25 = arith.constant 1.000000e+00 : f32
    %55 = vector.broadcast %cst_25 : f32 to vector<16x128xf32>
    %56 = arith.divf %55, %54 : vector<16x128xf32>
    %cst_26 = arith.constant 1.06140542 : f32
    %57 = vector.broadcast %cst_26 : f32 to vector<16x128xf32>
    %58 = arith.mulf %57, %56 : vector<16x128xf32>
    %cst_27 = arith.constant -1.45315206 : f32
    %59 = vector.broadcast %cst_27 : f32 to vector<16x128xf32>
    %60 = arith.addf %58, %59 : vector<16x128xf32>
    %61 = arith.mulf %60, %56 : vector<16x128xf32>
    %cst_28 = arith.constant 1.42141378 : f32
    %62 = vector.broadcast %cst_28 : f32 to vector<16x128xf32>
    %63 = arith.addf %61, %62 : vector<16x128xf32>
    %64 = arith.mulf %63, %56 : vector<16x128xf32>
    %cst_29 = arith.constant -0.284496725 : f32
    %65 = vector.broadcast %cst_29 : f32 to vector<16x128xf32>
    %66 = arith.addf %64, %65 : vector<16x128xf32>
    %67 = arith.mulf %66, %56 : vector<16x128xf32>
    %cst_30 = arith.constant 0.254829586 : f32
    %68 = vector.broadcast %cst_30 : f32 to vector<16x128xf32>
    %69 = arith.addf %67, %68 : vector<16x128xf32>
    %70 = arith.mulf %69, %56 : vector<16x128xf32>
    %71 = arith.mulf %50, %50 : vector<16x128xf32>
    %cst_31 = arith.constant 0.000000e+00 : f32
    %72 = vector.broadcast %cst_31 : f32 to vector<16x128xf32>
    %73 = arith.subf %72, %71 : vector<16x128xf32>
    %74 = math.exp %73 : vector<16x128xf32>
    %75 = arith.mulf %70, %74 : vector<16x128xf32>
    %cst_32 = arith.constant 1.000000e+00 : f32
    %76 = vector.broadcast %cst_32 : f32 to vector<16x128xf32>
    %77 = arith.subf %76, %75 : vector<16x128xf32>
    %cst_33 = arith.constant 0.000000e+00 : f32
    %78 = vector.broadcast %cst_33 : f32 to vector<16x128xf32>
    %79 = arith.cmpf olt, %49, %78 : vector<16x128xf32>
    %cst_34 = arith.constant 0.000000e+00 : f32
    %80 = vector.broadcast %cst_34 : f32 to vector<16x128xf32>
    %81 = arith.subf %80, %77 : vector<16x128xf32>
    %82 = arith.select %79, %81, %77 : vector<16x128xi1>, vector<16x128xf32>
    %cst_35 = arith.constant 1.000000e+00 : f32
    %83 = vector.broadcast %cst_35 : f32 to vector<16x128xf32>
    %84 = arith.addf %83, %82 : vector<16x128xf32>
    %85 = arith.mulf %47, %84 : vector<16x128xf32>
    %c0_36 = arith.constant 0 : index
    %c0_37 = arith.constant 0 : index
    %86 = vector.load %arg4[%c0_36, %c0_37] : memref<16x128xf32, #tpu.memory_space<vmem>>, vector<16x128xf32>
    tpu.vector_store %arg4[%c0_36, %c0_37], %85 {strides = array<i32>} : memref<16x128xf32, #tpu.memory_space<vmem>>, vector<16x128xf32>,
    return
  }
  func.func @transform_0(%arg0: i32) -> (i32, i32) {
    %c0_i32 = arith.constant 0 : i32
    %c0_i32_0 = arith.constant 0 : i32
    return %c0_i32, %arg0 : i32, i32
  }
  func.func @transform_1(%arg0: i32) -> (i32, i32) {
    %c0_i32 = arith.constant 0 : i32
    %c0_i32_0 = arith.constant 0 : i32
    %c0_i32_1 = arith.constant 0 : i32
    return %c0_i32, %c0_i32_0 : i32, i32
  }
  func.func @transform_2(%arg0: i32) -> (i32, i32) {
    %c0_i32 = arith.constant 0 : i32
    %c0_i32_0 = arith.constant 0 : i32
    %c0_i32_1 = arith.constant 0 : i32
    return %c0_i32, %c0_i32_0 : i32, i32
  }
  func.func @transform_3(%arg0: i32) -> (i32, i32) {
    %c0_i32 = arith.constant 0 : i32
    %c0_i32_0 = arith.constant 0 : i32
    return %c0_i32, %arg0 : i32, i32
  }
}

</mosaic_0001>

<bundles_post_ra>
// kernel: spatial_mlp_forward.1
= control target key start
LH: loop header
LB: loop body
LE: loop exit
PB: predicated region body
PF: predicated region fallthrough
CT: control target
= control target key end

     0   :  { %vm51_vm0 = vcmask 130048   ;;  %s1011_s0 = inlined_call_operand.vmem [shape: bf16[16,128], index: 0, kind: input, shape index: {}]   ;;  %s1012_s1 = inlined_call_operand.vmem [shape: bf16[64,16], index: 1, kind: input, shape index: {}]   ;;  %s1013_s2 = inlined_call_operand.vmem [shape: bf16[16,64], index: 2, kind: input, shape index: {}]   ;;  %s1014_s3 = inlined_call_operand.vmem [shape: f32[16,128], index: 3, kind: output, shape index: {}]  }
   0x1   :  { %v561_v0 = vld [vmem:[%s1011_s0] sm:$0xff]  ;;  %v558_v2 = vld [vmem:[%s1012_s1 + $0x8] sm:$0xff]  ;;  %v560_v3 = vld [vmem:[%s1012_s1 + $0x18] sm:$0xff] }
   0x2   :  { %v557_v1 = vld [vmem:[%s1012_s1] sm:$0xff]  ;;  %71 = vmatpush.bf16.msra.mxu0 %v561_v0  ;;  %563 = vmatpush.bf16.msra.mxu2 %v561_v0  ;;  %v559_v4 = vld [vmem:[%s1012_s1 + $0x10] sm:$0xff] }
   0x3   :  { %564 = vmatpush.bf16.msra.mxu3 %v561_v0 }
   0x5   :  { %548 = vmatmul.msk.bf16.vlgmr.msra.gmra.mxu0 %vm51_vm0, %v557_v1  ;;  %549 = vmatmul.msk.bf16.vlgmr.msra.gmra.mxu2 %vm51_vm0, %v558_v2 }
   0x6   :  { %551 = vmatmul.msk.bf16.vlgmr.msra.gmra.mxu3 %vm51_vm0, %v560_v3 }
  0x15   :  { %550 = vmatmul.msk.bf16.gmra.mxu2 %vm51_vm0, %v559_v4 }
  0x82   :  { %v640_v5 = vpop.f32.mrf.mxu0 }
  0x83   :  { %v643_v6 = vmul.f32 0.70710677, %v640_v5 }
  0x85   :  { %v109_v7 = vand.u32 2147483647, %v643_v6 }
  0x87   :  { %v117_v8 = vmul.f32 0.3275911, %v109_v7  ;;  %v325_v23 = vmul.f32 %v109_v7, %v109_v7 }
  0x88   :  { %v78_v9 = vpop.f32.mrf.mxu2 }
  0x89   :  { %v646_v10 = vadd.f32 1.0, %v117_v8  ;;  %v648_v11 = vmul.f32 0.70710677, %v78_v9  ;;  %v88_v12 = vpop.f32.mrf.mxu3  ;;  %v333_v30 = vsub.f32 0.0, %v325_v23  ;;  %v675_v33 = vmul.f32 0.5, %v78_v9 }
  0x8a   :  { %v650_v13 = vmul.f32 0.70710677, %v88_v12  ;;  %v653_v14 = vpop.f32.mrf.mxu0  ;;  %v677_v36 = vmul.f32 0.5, %v88_v12 }
  0x8b   :  { %565 = vrcp.f32 %v646_v10  ;;  %v111_v15 = vand.u32 2147483647, %v648_v11  ;;  %v658_v18 = vmul.f32 0.70710677, %v653_v14  ;;  %v142_v40 = vand.u32 2147483647, %v646_v10 }
  0x8c   :  { %v115_v16 = vand.u32 2147483647, %v650_v13  ;;  %v144_v41 = vand.u32 2147483648, %v646_v10  ;;  %v693_v46 = vmul.f32 1.442695, %v333_v30  ;;  %vm138_vm8 = vweird.f32 %v646_v10 }
  0x8d   :  { %v119_v17 = vmul.f32 0.3275911, %v111_v15  ;;  %v327_v24 = vmul.f32 %v111_v15, %v111_v15  ;;  %v110_v26 = vand.u32 2147483647, %v658_v18 }
  0x8e   :  { %v123_v19 = vmul.f32 0.3275911, %v115_v16  ;;  %v331_v28 = vmul.f32 %v115_v16, %v115_v16  ;;  %v707_v60 = vor.u32 1.1754944e-38, %v144_v41 }
  0x8f   :  { %v660_v20 = vadd.f32 1.0, %v119_v17  ;;  %v335_v31 = vsub.f32 0.0, %v327_v24  ;;  %v118_v34 = vmul.f32 0.3275911, %v110_v26  ;;  %v326_v57 = vmul.f32 %v110_v26, %v110_v26 }
  0x90   :  { %v80_v21 = vpop.f32.mrf.mxu2  ;;  %v664_v25 = vadd.f32 1.0, %v123_v19  ;;  %v339_v37 = vsub.f32 0.0, %v331_v28 }
  0x91   :  { %v662_v22 = vpop.eup %565  ;;  %567 = vrcp.f32 %v660_v20  ;;  %v671_v29 = vmul.f32 0.70710677, %v80_v21  ;;  %v673_v32 = vpop.f32.mrf.mxu3  ;;  %v684_v42 = vadd.f32 1.0, %v118_v34  ;;  %v345_v47 = vmul.f32 1.442695, %v335_v31 }
  0x92   :  { %v134_v27 = vmul.f32 %v662_v22, %v646_v10  ;;  %569 = vrcp.f32 %v664_v25  ;;  %v687_v43 = vmul.f32 0.70710677, %v673_v32  ;;  %v174_v49 = vand.u32 2147483648, %v660_v20 }
  0x93   :  { %v112_v38 = vand.u32 2147483647, %v671_v29  ;;  %v232_v51 = vand.u32 2147483647, %v664_v25  ;;  %571 = vrcp.f32 %v684_v42  ;;  %v234_v54 = vand.u32 2147483648, %v664_v25 }
  0x94   :  { %v135_v35 = vsub.f32 1.0, %v134_v27  ;;  %v353_v55 = vmul.f32 1.442695, %v339_v37  ;;  %v116_v59 = vand.u32 2147483647, %v687_v43  ;;  %573 = vpow2.f32 %v345_v47 }
  0x95   :  { %v120_v48 = vmul.f32 0.3275911, %v112_v38  ;;  %v709_v61 = vmul.f32 0.5, %v80_v21  ;;  %v328_v62 = vmul.f32 %v112_v38, %v112_v38  ;;  %v172_v63 = vand.u32 2147483647, %v660_v20 }
  0x96   :  { %v136_v52 = vmul.f32 %v662_v22, %v135_v35  ;;  %v712_v0 = vor.u32 1.1754944e-38, %v174_v49  ;;  %vm228_vm1 = vweird.f32 %v664_v25  ;;  %v716_v2 = vor.u32 1.1754944e-38, %v234_v54 }
  0x97   :  { %v680_v39 = vpop.eup %567  ;;  %v704_v58 = vadd.f32 1.0, %v120_v48  ;;  %v124_v3 = vmul.f32 0.3275911, %v116_v59  ;;  %vm723_vm3 = vcmp.eq.f32.partialorder %v232_v51, 8.507059e+37  ;;  %v334_v12 = vsub.f32 0.0, %v326_v57 }
  0x98   :  { %v689_v44 = vpop.f32.mrf.mxu2  ;;  %v691_v45 = vpop.eup %569  ;;  %v164_v53 = vmul.f32 %v680_v39, %v660_v20  ;;  %v719_v7 = vadd.f32 %v662_v22, %v136_v52  ;;  %vm153_vm4 = vweird.f32 %v684_v42  ;;  %v336_v17 = vsub.f32 0.0, %v328_v62 }
  0x99   :  { %v224_v50 = vmul.f32 %v691_v45, %v664_v25  ;;  %575 = vrcp.f32 %v704_v58  ;;  %v572_v4 = vpop.eup %571  ;;  %vm229_vm2 = vweird.f32 %v691_v45  ;;  %v332_v19 = vmul.f32 %v116_v59, %v116_v59 }
  0x9a   :  { %v165_v1 = vsub.f32 1.0, %v164_v53  ;;  %577 = vpow2.f32 %v353_v55  ;;  %v149_v16 = vmul.f32 %v572_v4, %v684_v42  ;;  %v157_v21 = vand.u32 2147483647, %v684_v42  ;;  %v738_v27 = vpop.eup %573  ;;  %vm759_vm7 = vmor %vm228_vm1, %vm229_vm2 }
  0x9b   :  { %v225_v56 = vsub.f32 1.0, %v224_v50  ;;  %v159_v23 = vand.u32 2147483648, %v684_v42  ;;  %v733_v24 = vadd.f32 1.0, %v124_v3  ;;  %v736_v26 = vmul.f32 0.70710677, %v689_v44 }
  0x9c   :  { %v166_v28 = vmul.f32 %v680_v39, %v165_v1  ;;  %v150_v30 = vsub.f32 1.0, %v149_v16  ;;  %vm154_vm5 = vweird.f32 %v572_v4  ;;  %v189_v37 = vand.u32 2147483648, %v704_v58 }
  0x9d   :  { %v226_v8 = vmul.f32 %v691_v45, %v225_v56  ;;  %v749_v38 = vmul.f32 0.5, %v673_v32  ;;  %579 = vrcp.f32 %v733_v24  ;;  %vm169_vm6 = vweird.f32 %v680_v39  ;;  %vm770_vm10 = vmor %vm153_vm4, %vm154_vm5 }
  0x9e   :  { %v151_v48 = vmul.f32 %v572_v4, %v150_v30  ;;  %v347_v32 = vmul.f32 1.442695, %v336_v17  ;;  %v340_v50 = vsub.f32 0.0, %v332_v19  ;;  %vm139_vm9 = vweird.f32 %v662_v22 }
  0x9f   :  { %v744_v34 = vpop.eup %575  ;;  %v227_v35 = vadd.f32 %v691_v45, %v226_v8  ;;  %vm774_vm11 = vcmp.eq.f32.partialorder %v157_v21, 8.507059e+37  ;;  %v160_v52 = vor.u32 1.1754944e-38, %v159_v23  ;;  %v778_v53 = vmul.f32 1.442695, %v334_v12 }
  0xa0   :  { %v727_v15 = vpop.f32.mrf.mxu2  ;;  %v752_v41 = vpop.eup %577  ;;  %v179_v49 = vmul.f32 %v744_v34, %v704_v58  ;;  %v113_v54 = vand.u32 2147483647, %v736_v26  ;;  %v167_v55 = vadd.f32 %v680_v39, %v166_v28  ;;  %vm168_vm12 = vweird.f32 %v660_v20 }
  0xa1   :  { %v742_v31 = vmul.f32 0.70710677, %v727_v15  ;;  %v152_v56 = vadd.f32 %v572_v4, %v151_v48  ;;  %v187_v42 = vand.u32 2147483647, %v704_v58  ;;  %v785_v62 = vor.u32 1.1754944e-38, %v189_v37  ;;  %vm840_vm4 = vmor %vm168_vm12, %vm169_vm6 }
  0xa2   :  { %v180_v59 = vsub.f32 1.0, %v179_v49  ;;  %v121_v1 = vmul.f32 0.3275911, %v113_v54  ;;  %v231_v3 = vsel %vm759_vm7, %v691_v45, %v227_v35  ;;  %vm790_vm13 = vcmp.eq.f32.partialorder %v172_v63, 8.507059e+37  ;;  %vm854_vm7 = vmor %vm138_vm8, %vm139_vm9 }
  0xa3   :  { %v114_v57 = vand.u32 2147483647, %v742_v31  ;;  %v156_v12 = vsel %vm770_vm10, %v572_v4, %v152_v56  ;;  %581 = vpow2.f32 %v347_v32  ;;  %v355_v16 = vmul.f32 1.442695, %v340_v50  ;;  %v580_v19 = vpop.eup %579 }
  0xa4   :  { %v798_v21 = vsel %vm774_vm11, %v160_v52, %v156_v12  ;;  %vm183_vm14 = vweird.f32 %v704_v58  ;;  %vm243_vm15 = vweird.f32 %v733_v24  ;;  %v802_v45 = vadd.f32 1.0, %v121_v1 }
  0xa5   :  { %v122_v17 = vmul.f32 0.3275911, %v114_v57  ;;  %v329_v63 = vmul.f32 %v113_v54, %v113_v54  ;;  %v254_v23 = vmul.f32 1.0614054, %v798_v21  ;;  %v239_v28 = vmul.f32 %v580_v19, %v733_v24 }
  0xa6   :  { %v247_v4 = vand.u32 2147483647, %v733_v24  ;;  %v810_v30 = vsel %vm723_vm3, %v716_v2, %v231_v3  ;;  %v181_v35 = vmul.f32 %v744_v34, %v180_v59  ;;  %vm184_vm0 = vweird.f32 %v744_v34 }
  0xa7   :  { %vm814_vm1 = vcmp.eq.f32.partialorder %v187_v42, 8.507059e+37  ;;  %v249_v47 = vand.u32 2147483648, %v733_v24  ;;  %583 = vrcp.f32 %v802_v45  ;;  %v262_v48 = vadd.f32 -1.4531521, %v254_v23  ;;  %vm185_vm8 = vmor %vm183_vm14, %vm184_vm0 }
  0xa8   :  { %v240_v49 = vsub.f32 1.0, %v239_v28  ;;  %585 = vpow2.f32 %v355_v16  ;;  %v820_v32 = vadd.f32 1.0, %v122_v17  ;;  %vm824_vm2 = vcmp.eq.f32.partialorder %v142_v40, 8.507059e+37 }
  0xa9   :  { %v204_v9 = vand.u32 2147483648, %v802_v45  ;;  %v337_v50 = vsub.f32 0.0, %v329_v63  ;;  %v829_v51 = vmul.f32 %v114_v57, %v114_v57  ;;  %v259_v25 = vmul.f32 1.0614054, %v810_v30  ;;  %v832_v52 = vpop.eup %581 }
  0xaa   :  { %v270_v54 = vmul.f32 %v262_v48, %v798_v21  ;;  %v241_v56 = vmul.f32 %v580_v19, %v240_v49  ;;  %vm244_vm3 = vweird.f32 %v580_v19  ;;  %v202_v42 = vand.u32 2147483647, %v802_v45 }
  0xab   :  { %v182_v57 = vadd.f32 %v744_v34, %v181_v35  ;;  %vm845_vm5 = vcmp.eq.f32.partialorder %v247_v4, 8.507059e+37  ;;  %v250_v1 = vor.u32 1.1754944e-38, %v249_v47  ;;  %587 = vrcp.f32 %v820_v32  ;;  %vm245_vm10 = vmor %vm243_vm15, %vm244_vm3 }
  0xac   :  { %v278_v20 = vadd.f32 1.4214138, %v270_v54  ;;  %v242_v12 = vadd.f32 %v580_v19, %v241_v56  ;;  %vm198_vm6 = vweird.f32 %v802_v45  ;;  %v267_v16 = vadd.f32 -1.4531521, %v259_v25 }
  0xad   :  { %v171_v17 = vsel %vm840_vm4, %v680_v39, %v167_v55  ;;  %v584_v63 = vpop.eup %583  ;;  %v205_v23 = vor.u32 1.1754944e-38, %v204_v9  ;;  %v864_v28 = vmul.f32 1.442695, %v337_v50  ;;  %v338_v10 = vsub.f32 0.0, %v829_v51 }
  0xae   :  { %v870_v4 = vsel %vm790_vm13, %v712_v0, %v171_v17  ;;  %v872_v35 = vpop.eup %585  ;;  %v194_v39 = vmul.f32 %v584_v63, %v802_v45  ;;  %vm879_vm9 = vcmp.eq.f32.partialorder %v202_v42, 8.507059e+37  ;;  %v217_v55 = vand.u32 2147483647, %v820_v32 }
  0xaf   :  { %v219_v47 = vand.u32 2147483648, %v820_v32  ;;  %v246_v8 = vsel %vm245_vm10, %v580_v19, %v242_v12  ;;  %v275_v48 = vmul.f32 %v267_v16, %v810_v30  ;;  %v186_v58 = vsel %vm185_vm8, %v744_v34, %v182_v57 }
  0xb0   :  { %v887_v0 = vsel %vm845_vm5, %v250_v1, %v246_v8  ;;  %v255_v49 = vmul.f32 1.0614054, %v870_v4  ;;  %v286_v9 = vmul.f32 %v278_v20, %v798_v21  ;;  %v195_v50 = vsub.f32 1.0, %v194_v39 }
  0xb1   :  { %vm213_vm11 = vweird.f32 %v820_v32  ;;  %v260_v25 = vmul.f32 1.0614054, %v887_v0  ;;  %v898_v19 = vsel %vm814_vm1, %v785_v62, %v186_v58  ;;  %v588_v54 = vpop.eup %587  ;;  %v283_v56 = vadd.f32 1.4214138, %v275_v48 }
  0xb2   :  { %v256_v42 = vmul.f32 1.0614054, %v898_v19  ;;  %v263_v40 = vadd.f32 -1.4531521, %v255_v49  ;;  %v141_v34 = vsel %vm854_vm7, %v662_v22, %v719_v7  ;;  %v196_v57 = vmul.f32 %v584_v63, %v195_v50 }
  0xb3   :  { %vm199_vm12 = vweird.f32 %v584_v63  ;;  %v209_v59 = vmul.f32 %v588_v54, %v820_v32  ;;  %v220_v1 = vor.u32 1.1754944e-38, %v219_v47  ;;  %v268_v20 = vadd.f32 -1.4531521, %v260_v25 }
  0xb4   :  { %v291_v37 = vmul.f32 %v283_v56, %v810_v30  ;;  %v264_v62 = vadd.f32 -1.4531521, %v256_v42  ;;  %v271_v12 = vmul.f32 %v263_v40, %v870_v4  ;;  %v294_v16 = vadd.f32 -0.28449672, %v286_v9  ;;  %vm200_vm13 = vmor %vm198_vm6, %vm199_vm12 }
  0xb5   :  { %v197_v17 = vadd.f32 %v584_v63, %v196_v57  ;;  %v210_v39 = vsub.f32 1.0, %v209_v59  ;;  %v911_v8 = vsel %vm824_vm2, %v707_v60, %v141_v34  ;;  %v276_v22 = vmul.f32 %v268_v20, %v887_v0 }
  0xb6   :  { %v299_v7 = vadd.f32 -0.28449672, %v291_v37  ;;  %v272_v3 = vmul.f32 %v264_v62, %v898_v19  ;;  %v279_v47 = vadd.f32 1.4214138, %v271_v12  ;;  %vm214_vm14 = vweird.f32 %v588_v54 }
  0xb7   :  { %v211_v48 = vmul.f32 %v588_v54, %v210_v39  ;;  %v201_v58 = vsel %vm200_vm13, %v584_v63, %v197_v17  ;;  %v253_v49 = vmul.f32 1.0614054, %v911_v8  ;;  %v284_v9 = vadd.f32 1.4214138, %v276_v22  ;;  %vm215_vm15 = vmor %vm213_vm11, %vm214_vm14 }
  0xb8   :  { %v307_v50 = vmul.f32 %v299_v7, %v810_v30  ;;  %v921_v60 = vsel %vm879_vm9, %v205_v23, %v201_v58  ;;  %v280_v45 = vadd.f32 1.4214138, %v272_v3  ;;  %v302_v2 = vmul.f32 %v294_v16, %v798_v21 }
  0xb9   :  { %v212_v25 = vadd.f32 %v588_v54, %v211_v48  ;;  %v257_v56 = vmul.f32 1.0614054, %v921_v60  ;;  %v287_v42 = vmul.f32 %v279_v47, %v870_v4  ;;  %v292_v63 = vmul.f32 %v284_v9, %v887_v0 }
  0xba   :  { %v315_v40 = vadd.f32 0.2548296, %v307_v50  ;;  %v288_v34 = vmul.f32 %v280_v45, %v898_v19  ;;  %v261_v57 = vadd.f32 -1.4531521, %v253_v49  ;;  %vm218_vm0 = vcmp.eq.f32.partialorder %v217_v55, 8.507059e+37 }
  0xbb   :  { %v216_v24 = vsel %vm215_vm15, %v588_v54, %v212_v25  ;;  %v265_v23 = vadd.f32 -1.4531521, %v257_v56  ;;  %v295_v59 = vadd.f32 -0.28449672, %v287_v42  ;;  %vm379_vm1 = vcmp.lt.f32.partialorder %v650_v13, 0.0 }
  0xbc   :  { %v931_v20 = vsel %vm218_vm0, %v220_v1, %v216_v24  ;;  %v300_v37 = vadd.f32 -0.28449672, %v292_v63  ;;  %v323_v62 = vmul.f32 %v315_v40, %v810_v30  ;;  %v296_v12 = vadd.f32 -0.28449672, %v288_v34 }
  0xbd   :  { %v310_v32 = vadd.f32 0.2548296, %v302_v2  ;;  %v258_v16 = vmul.f32 1.0614054, %v931_v20  ;;  %v273_v17 = vmul.f32 %v265_v23, %v921_v60  ;;  %v303_v39 = vmul.f32 %v295_v59, %v870_v4 }
  0xbe   :  { %v308_v54 = vmul.f32 %v300_v37, %v887_v0  ;;  %v363_v55 = vmul.f32 %v752_v41, %v323_v62  ;;  %v304_v22 = vmul.f32 %v296_v12, %v898_v19  ;;  %v269_v1 = vmul.f32 %v261_v57, %v911_v8 }
  0xbf   :  { %589 = vpow2.f32 %v693_v46  ;;  %v266_v7 = vadd.f32 -1.4531521, %v258_v16  ;;  %v281_v30 = vadd.f32 1.4214138, %v273_v17  ;;  %v311_v3 = vadd.f32 0.2548296, %v303_v39 }
  0xc0   :  { %vm375_vm2 = vcmp.lt.f32.partialorder %v648_v11, 0.0  ;;  %591 = vpow2.f32 %v778_v53  ;;  %v316_v47 = vadd.f32 0.2548296, %v308_v54  ;;  %v371_v48 = vsub.f32 1.0, %v363_v55 }
  0xc1   :  { %v312_v58 = vadd.f32 0.2548296, %v304_v22  ;;  %vm376_vm3 = vcmp.lt.f32.partialorder %v671_v29, 0.0  ;;  %v274_v41 = vmul.f32 %v266_v7, %v931_v20  ;;  %v289_v49 = vmul.f32 %v281_v30, %v921_v60 }
  0xc2   :  { %v319_v9 = vmul.f32 %v311_v3, %v870_v4  ;;  %v277_v50 = vadd.f32 1.4214138, %v269_v1  ;;  %v351_v46 = vmul.f32 1.442695, %v338_v10  ;;  %v324_v45 = vmul.f32 %v316_v47, %v887_v0 }
  0xc3   :  { %v387_v2 = vsub.f32 0.0, %v371_v48  ;;  %v320_v53 = vmul.f32 %v312_v58, %v898_v19  ;;  %v282_v25 = vadd.f32 1.4214138, %v274_v41  ;;  %v297_v56 = vadd.f32 -0.28449672, %v289_v49 }
  0xc4   :  { %v359_v42 = vmul.f32 %v738_v27, %v319_v9  ;;  %v285_v63 = vmul.f32 %v277_v50, %v911_v8  ;;  %v318_v40 = vmul.f32 %v310_v32, %v798_v21  ;;  %593 = vpow2.f32 %v864_v28 }
  0xc5   :  { %v364_v4 = vmul.f32 %v872_v35, %v324_v45  ;;  %v360_v51 = vmul.f32 %v832_v52, %v320_v53  ;;  %v590_v10 = vpop.eup %589  ;;  %v290_v0 = vmul.f32 %v282_v25, %v931_v20  ;;  %v395_v19 = vsel %vm379_vm1, %v387_v2, %v371_v48 }
  0xc6   :  { %v305_v34 = vmul.f32 %v297_v56, %v921_v60  ;;  %v367_v57 = vsub.f32 1.0, %v359_v42  ;;  %v592_v27 = vpop.eup %591  ;;  %vm380_vm4 = vcmp.lt.f32.partialorder %v687_v43, 0.0  ;;  %v293_v23 = vadd.f32 -0.28449672, %v285_v63 }
  0xc7   :  { %v372_v24 = vsub.f32 1.0, %v364_v4  ;;  %v368_v21 = vsub.f32 1.0, %v360_v51  ;;  %v298_v28 = vadd.f32 -0.28449672, %v290_v0  ;;  %595 = vpow2.f32 %v351_v46 }
  0xc8   :  { %v313_v35 = vadd.f32 0.2548296, %v305_v34  ;;  %v383_v59 = vsub.f32 0.0, %v367_v57  ;;  %v403_v37 = vadd.f32 1.0, %v395_v19  ;;  %v301_v12 = vmul.f32 %v293_v23, %v911_v8 }
  0xc9   :  { %v388_v52 = vsub.f32 0.0, %v372_v24  ;;  %v384_v62 = vsub.f32 0.0, %v368_v21  ;;  %v358_v13 = vmul.f32 %v592_v27, %v318_v40  ;;  %v306_v32 = vmul.f32 %v298_v28, %v931_v20 }
  0xca   :  { %v321_v16 = vmul.f32 %v313_v35, %v921_v60  ;;  %v391_v17 = vsel %vm375_vm2, %v383_v59, %v367_v57  ;;  %v594_v39 = vpop.eup %593  ;;  %v309_v1 = vadd.f32 0.2548296, %v301_v12  ;;  %v411_v48 = vmul.f32 %v403_v37, %v677_v36 }
  0xcb   :  { %v396_v54 = vsel %vm380_vm4, %v388_v52, %v372_v24  ;;  %v392_v55 = vsel %vm376_vm3, %v384_v62, %v368_v21  ;;  %v399_v22 = vadd.f32 1.0, %v391_v17  ;;  %v314_v7 = vadd.f32 0.2548296, %v306_v32 }
  0xcc   :  { %v404_v30 = vadd.f32 1.0, %v396_v54  ;;  %v361_v3 = vmul.f32 %v594_v39, %v321_v16  ;;  %v400_v47 = vadd.f32 1.0, %v392_v55  ;;  %v317_v11 = vmul.f32 %v309_v1, %v911_v8 }
  0xcd   :  { %v407_v60 = vmul.f32 %v399_v22, %v675_v33  ;;  %v596_v58 = vpop.eup %595  ;;  %v322_v41 = vmul.f32 %v314_v7, %v931_v20  ;;  %v366_v9 = vsub.f32 1.0, %v358_v13  ;;  %vm377_vm5 = vcmp.lt.f32.partialorder %v736_v26, 0.0 }
  0xce   :  { %v412_v43 = vmul.f32 %v404_v30, %v749_v38  ;;  %v369_v49 = vsub.f32 1.0, %v361_v3  ;;  %v408_v29 = vmul.f32 %v400_v47, %v709_v61  ;;  %v357_v50 = vmul.f32 %v590_v10, %v317_v11 }
  0xcf   :  { %v362_v46 = vmul.f32 %v596_v58, %v322_v41  ;;  %v382_v25 = vsub.f32 0.0, %v366_v9  ;;  %vm378_vm7 = vcmp.lt.f32.partialorder %v742_v31, 0.0  ;;  %vm374_vm6 = vcmp.lt.f32.partialorder %v658_v18, 0.0 }
  0xd0   :  { %v418_v45 = vpack.c.bf16 %v412_v43, %v411_v48  ;;  %v385_v2 = vsub.f32 0.0, %v369_v49  ;;  %v416_v53 = vpack.c.bf16 %v408_v29, %v407_v60  ;;  %v365_v8 = vsub.f32 1.0, %v357_v50 }
  0xd1   :  { %v370_v36 = vsub.f32 1.0, %v362_v46  ;;  %v97_v61 = vmul.f32 0.5, %v689_v44  ;;  %v98_v63 = vmul.f32 0.5, %v727_v15  ;;  %v390_v4 = vsel %vm374_vm6, %v382_v25, %v366_v9  ;;  %v562_v15 = vld [vmem:[%s1013_s2] sm:$0xff] }
  0xd2   :  { %432 = vmatpush.bf16.msra.mxu1 %v418_v45  ;;  %v393_v33 = vsel %vm377_vm5, %v385_v2, %v369_v49  ;;  %v381_v42 = vsub.f32 0.0, %v365_v8  ;;  %vm373_vm10 = vcmp.lt.f32.partialorder %v643_v6, 0.0  ;;  %v398_v0 = vadd.f32 1.0, %v390_v4 }
  0xd3   :  { %v386_v56 = vsub.f32 0.0, %v370_v36  ;;  %v401_v38 = vadd.f32 1.0, %v393_v33  ;;  %v94_v31 = vmul.f32 0.5, %v653_v14  ;;  %v93_v57 = vmul.f32 0.5, %v640_v5 }
  0xd4   :  { %v389_v10 = vsel %vm373_vm10, %v381_v42, %v365_v8  ;;  %vm424_vm8 = vcmask 523264  }
  0xd5   :  { %v394_v20 = vsel %vm378_vm7, %v386_v56, %v370_v36  ;;  %v409_v51 = vmul.f32 %v401_v38, %v97_v61  ;;  %v397_v34 = vadd.f32 1.0, %v389_v10  ;;  %v406_v18 = vmul.f32 %v398_v0, %v94_v31 }
  0xd6   :  { %v402_v40 = vadd.f32 1.0, %v394_v20 }
  0xd7   :  { %v405_v44 = vmul.f32 %v397_v34, %v93_v57 }
  0xd8   :  { %v410_v26 = vmul.f32 %v402_v40, %v98_v63 }
  0xd9   :  { %v415_v27 = vpack.c.bf16 %v406_v18, %v405_v44 }
  0xda   :  { %v417_v19 = vpack.c.bf16 %v410_v26, %v409_v51 }
  0xdc   :  { %433 = vmatpush.bf16.msra.mxu1 %v417_v19 }
  0xe0   :  { %434 = vmatpush.bf16.msra.mxu1 %v416_v53 }
  0xe4   :  { %435 = vmatpush.bf16.msra.mxu1 %v415_v27 }
  0xe7   :  { %556 = vmatmul.msk.bf16.vlgmr.msra.gmra.mxu1 %vm424_vm8, %v562_v15 }
 0x164   :  { %v989_v6 = vpop.f32.mrf.mxu1 }
 0x165   :  { %v992_v24 = vmul.f32 0.70710677, %v989_v6  ;;  %v442_v34 = vmul.f32 0.5, %v989_v6 }
 0x167   :  { %v446_v14 = vand.u32 2147483647, %v992_v24  ;;  %vm512_vm2 = vcmp.lt.f32.partialorder %v992_v24, 0.0 }
 0x169   :  { %v448_v21 = vmul.f32 0.3275911, %v446_v14  ;;  %v500_v1 = vmul.f32 %v446_v14, %v446_v14 }
 0x16b   :  { %v450_v5 = vadd.f32 1.0, %v448_v21  ;;  %v502_v60 = vsub.f32 0.0, %v500_v1 }
 0x16c   :  { %v995_v23 = vpop.f32.mrf.mxu1 }
 0x16d   :  { %597 = vrcp.f32 %v450_v5  ;;  %v998_v28 = vmul.f32 0.70710677, %v995_v23  ;;  %v463_v13 = vand.u32 2147483648, %v450_v5  ;;  %v461_v16 = vand.u32 2147483647, %v450_v5 }
 0x16e   :  { %vm457_vm11 = vweird.f32 %v450_v5  ;;  %v504_v9 = vmul.f32 1.442695, %v502_v60  ;;  %v443_v24 = vmul.f32 0.5, %v995_v23 }
 0x16f   :  { %v447_v35 = vand.u32 2147483647, %v998_v28  ;;  %v464_v39 = vor.u32 1.1754944e-38, %v463_v13  ;;  %vm462_vm13 = vcmp.eq.f32.partialorder %v461_v16, 8.507059e+37  ;;  %vm513_vm3 = vcmp.lt.f32.partialorder %v998_v28, 0.0 }
 0x171   :  { %v449_v59 = vmul.f32 0.3275911, %v447_v35  ;;  %v501_v2 = vmul.f32 %v447_v35, %v447_v35 }
 0x173   :  { %v598_v52 = vpop.eup %597  ;;  %v451_v62 = vadd.f32 1.0, %v449_v59  ;;  %v503_v25 = vsub.f32 0.0, %v501_v2 }
 0x174   :  { %v453_v37 = vmul.f32 %v598_v52, %v450_v5  ;;  %vm458_vm9 = vweird.f32 %v598_v52 }
 0x175   :  { %599 = vrcp.f32 %v451_v62  ;;  %vm459_vm12 = vmor %vm457_vm11, %vm458_vm9  ;;  %v478_v48 = vand.u32 2147483648, %v451_v62  ;;  %v476_v58 = vand.u32 2147483647, %v451_v62  ;;  %vm472_vm15 = vweird.f32 %v451_v62 }
 0x176   :  { %v454_v12 = vsub.f32 1.0, %v453_v37  ;;  %601 = vpow2.f32 %v504_v9  ;;  %v506_v61 = vmul.f32 1.442695, %v503_v25 }
 0x177   :  { %v479_v29 = vor.u32 1.1754944e-38, %v478_v48  ;;  %vm477_vm1 = vcmp.eq.f32.partialorder %v476_v58, 8.507059e+37 }
 0x178   :  { %v455_v32 = vmul.f32 %v598_v52, %v454_v12  ;;  %603 = vpow2.f32 %v506_v61 }
 0x17a   :  { %v456_v17 = vadd.f32 %v598_v52, %v455_v32 }
 0x17b   :  { %v600_v54 = vpop.eup %599 }
 0x17c   :  { %v460_v55 = vsel %vm459_vm12, %v598_v52, %v456_v17  ;;  %v468_v7 = vmul.f32 %v600_v54, %v451_v62  ;;  %vm473_vm14 = vweird.f32 %v600_v54  ;;  %v602_v63 = vpop.eup %601 }
 0x17d   :  { %v465_v22 = vsel %vm462_vm13, %v464_v39, %v460_v55  ;;  %vm474_vm0 = vmor %vm472_vm15, %vm473_vm14 }
 0x17e   :  { %v482_v30 = vmul.f32 1.0614054, %v465_v22  ;;  %v469_v3 = vsub.f32 1.0, %v468_v7  ;;  %v604_v44 = vpop.eup %603 }
 0x180   :  { %v484_v47 = vadd.f32 -1.4531521, %v482_v30  ;;  %v470_v11 = vmul.f32 %v600_v54, %v469_v3 }
 0x182   :  { %v486_v41 = vmul.f32 %v484_v47, %v465_v22  ;;  %v471_v43 = vadd.f32 %v600_v54, %v470_v11 }
 0x184   :  { %v488_v49 = vadd.f32 1.4214138, %v486_v41  ;;  %v475_v50 = vsel %vm474_vm0, %v600_v54, %v471_v43 }
 0x185   :  { %v480_v45 = vsel %vm477_vm1, %v479_v29, %v475_v50 }
 0x186   :  { %v490_v46 = vmul.f32 %v488_v49, %v465_v22  ;;  %v483_v53 = vmul.f32 1.0614054, %v480_v45 }
 0x188   :  { %v492_v36 = vadd.f32 -0.28449672, %v490_v46  ;;  %v485_v33 = vadd.f32 -1.4531521, %v483_v53 }
 0x18a   :  { %v494_v8 = vmul.f32 %v492_v36, %v465_v22  ;;  %v487_v56 = vmul.f32 %v485_v33, %v480_v45 }
 0x18c   :  { %v496_v38 = vadd.f32 0.2548296, %v494_v8  ;;  %v489_v20 = vadd.f32 1.4214138, %v487_v56 }
 0x18e   :  { %v498_v42 = vmul.f32 %v496_v38, %v465_v22  ;;  %v491_v40 = vmul.f32 %v489_v20, %v480_v45 }
 0x190   :  { %v508_v4 = vmul.f32 %v602_v63, %v498_v42  ;;  %v493_v26 = vadd.f32 -0.28449672, %v491_v40 }
 0x192   :  { %v510_v51 = vsub.f32 1.0, %v508_v4  ;;  %v495_v10 = vmul.f32 %v493_v26, %v480_v45 }
 0x194   :  { %v514_v0 = vsub.f32 0.0, %v510_v51  ;;  %v497_v19 = vadd.f32 0.2548296, %v495_v10 }
 0x196   :  { %v516_v31 = vsel %vm512_vm2, %v514_v0, %v510_v51  ;;  %v499_v18 = vmul.f32 %v497_v19, %v480_v45 }
 0x197   :  { %v518_v57 = vadd.f32 1.0, %v516_v31 }
 0x198   :  { %v509_v15 = vmul.f32 %v604_v44, %v499_v18 }
 0x199   :  { %v520_v27 = vmul.f32 %v518_v57, %v442_v34 }
 0x19a   :  { %v511_v14 = vsub.f32 1.0, %v509_v15 }
 0x19b   :  { %522 = vst [vmem:[%s1014_s3] sm:$0xff] %v520_v27 }
 0x19c   :  { %v515_v21 = vsub.f32 0.0, %v511_v14 }
 0x19e   :  { %v517_v5 = vsel %vm513_vm3, %v515_v21, %v511_v14 }
 0x19f   :  { %v519_v35 = vadd.f32 1.0, %v517_v5 }
 0x1a1   :  { %v521_v59 = vmul.f32 %v519_v35, %v443_v24 }
 0x1a3   :  { %523 = vst [vmem:[%s1014_s3 + $0x8] sm:$0xff] %v521_v59 }

</bundles_post_ra>
